<compile_context>
chip_gen: v7x
topology: tpu7x:2x2x1
jax: 0.10.0
libtpu: 0.0.40
codegen_flags: <defaults>
</compile_context>

<pallas_src>
import jax
import jax.numpy as jnp
from jax import lax
from jax.experimental import pallas as pl
from jax.experimental.pallas import tpu as pltpu


def _round_up(x, m):
    return ((x + m - 1) // m) * m


def _pick_vmem_limit():
    """Scoped-VMEM limit: ~75% of physical (96 MiB on v5e/v6e, 48 MiB on v7x)."""
    cap = 64 * 1024 * 1024  # conservative fallback (v7x physical per-core)
    try:
        info = pltpu.get_tpu_info()
        cap = int(getattr(info, "vmem_capacity_bytes", cap) or cap)
    except Exception:
        pass
    return max(16 * 1024 * 1024, (cap * 3) // 4)


def _pick_t_chunk(S, B_pad, H_pad, in_itemsize, out_itemsize, vmem_limit, weight_bytes):
    """Largest chunk s.t. double-buffered in/out chunks + weight + scratch fit."""
    scratch_bytes = B_pad * H_pad * 4
    margin = 4 * 1024 * 1024                      # Mosaic-internal scratch headroom
    budget = vmem_limit - weight_bytes - scratch_bytes - margin
    per_t = 2 * B_pad * H_pad * (in_itemsize + out_itemsize)   # 2x-buffered in + out
    t = budget // per_t if per_t > 0 else 1
    return int(max(1, min(t, 64, S)))


def rnn_chunk_kernel(xproj_ref, whh_t_ref, out_ref, h_scratch):
    """One grid step = T_CHUNK RNN timesteps for one batch block.

    xproj_ref : (T_CHUNK, b_blk, H)  precomputed x_t @ W_ih^T + b  (compute dtype)
    whh_t_ref : (H, H)               W_hh^T, whole-array VMEM resident (compute dtype)
    out_ref   : (T_CHUNK, b_blk, H)  h_t for each timestep (f32)
    h_scratch : (b_blk, H) f32 VMEM  hidden state carried across time chunks
    """
    # Reset the carry at the first time chunk of every batch block.
    @pl.when(pl.program_id(1) == 0)
    def _():
        h_scratch[...] = jnp.zeros_like(h_scratch)

    whh_t = whh_t_ref[...]
    compute_dtype = whh_t.dtype
    t_chunk = xproj_ref.shape[0]

    def step(i, h):
        # h stays f32; only the MXU operands are cast to the compute dtype.
        pre = xproj_ref[i].astype(jnp.float32) + jnp.dot(
            h.astype(compute_dtype), whh_t, preferred_element_type=jnp.float32)
        h_new = jnp.tanh(pre)
        out_ref[i] = h_new.astype(out_ref.dtype)
        return h_new

    # Partial unroll: scheduling visibility without vreg-live-range blowup.
    h_scratch[...] = lax.fori_loop(0, t_chunk, step, h_scratch[...],
                                   unroll=min(8, t_chunk))


def encoder_rnn_forward(indices, params, *, t_chunk=None, compute_dtype=jnp.bfloat16):
    """Forward pass equivalent to EncoderRNN.forward (eval mode).

    indices : (seq_len, batch) int32 token ids
    returns : (output (seq_len, batch, hidden), hidden (1, batch, hidden)), f32
    """
    emb_table = params["embedding"]          # (V, H)
    w_ih = params["w_ih"]                    # (H, H)
    w_hh = params["w_hh"]                    # (H, H)
    b_ih = params["b_ih"]                    # (H,)
    b_hh = params["b_hh"]                    # (H,)

    S, B = indices.shape
    V, H = emb_table.shape

    compute_dtype = jnp.dtype(compute_dtype)
    in_itemsize = compute_dtype.itemsize

    # ---- Hoisted, time-independent work (plain-JAX glue) --------------------
    # Dropout (eval) is identity, so the embedding folds straight into the
    # input projection: proj_table[v] = emb[v] @ W_ih^T + (b_ih + b_hh).
    proj_table = (emb_table.astype(jnp.float32) @ w_ih.T.astype(jnp.float32)
                  + (b_ih + b_hh).astype(jnp.float32))            # (V, H)

    # ---- Pad to TPU tile-friendly shapes -------------------------------------
    H_pad = _round_up(H, 128)                              # lane-dense last dim
    sublane = 16 if in_itemsize == 2 else 8                # native sublane tile
    B_pad = _round_up(B, sublane)

    vmem_limit = _pick_vmem_limit()
    weight_bytes = H_pad * H_pad * in_itemsize
    if t_chunk is None:
        t_chunk = _pick_t_chunk(S, B_pad, H_pad, in_itemsize, 4, vmem_limit,
                                weight_bytes)
    t_chunk = max(1, min(int(t_chunk), S))
    S_pad = _round_up(S, t_chunk)

    # Batch blocking: split across the two v7x TensorCores when it stays
    # sublane-aligned; harmless single block otherwise / on 1-TC chips.
    b_blk = B_pad // 2 if (B_pad % (2 * sublane) == 0) else B_pad

    proj_pad = jnp.zeros((V, H_pad), jnp.float32).at[:, :H].set(proj_table)
    whh_t_pad = (jnp.zeros((H_pad, H_pad), jnp.float32)
                 .at[:H, :H].set(w_hh.T.astype(jnp.float32))
                 .astype(compute_dtype))
    idx_pad = jnp.zeros((S_pad, B_pad), indices.dtype).at[:S, :B].set(indices)

    # Per-token gather of the precomputed projection (time-independent),
    # streamed in the compute dtype (bf16 halves the dominant HBM stream).
    xproj = proj_pad[idx_pad].astype(compute_dtype)        # (S_pad, B_pad, H_pad)

    grid = (B_pad // b_blk, S_pad // t_chunk)

    cost = pl.CostEstimate(
        flops=2 * S_pad * B_pad * H_pad * H_pad,           # recurrent matmuls
        transcendentals=S_pad * B_pad * H_pad,             # tanh
        bytes_accessed=int(S_pad * B_pad * H_pad * (in_itemsize + 4)
                           + H_pad * H_pad * in_itemsize),
    )

    out_pad = pl.pallas_call(
        rnn_chunk_kernel,
        out_shape=jax.ShapeDtypeStruct((S_pad, B_pad, H_pad), jnp.float32),
        grid_spec=pltpu.PrefetchScalarGridSpec(
            num_scalar_prefetch=0,
            grid=grid,
            in_specs=[
                # x_proj chunk for (batch block b, time chunk t)
                pl.BlockSpec((t_chunk, b_blk, H_pad), lambda b, t: (t, b, 0)),
                # W_hh^T: whole-array VMEM resident, single copy (no 2x buffering)
                pl.BlockSpec(memory_space=pltpu.MemorySpace.VMEM),
            ],
            out_specs=pl.BlockSpec((t_chunk, b_blk, H_pad), lambda b, t: (t, b, 0)),
            scratch_shapes=[pltpu.VMEM((b_blk, H_pad), jnp.float32)],
        ),
        compiler_params=pltpu.CompilerParams(
            # time is a serial recurrence; batch blocks are independent
            dimension_semantics=("parallel", "arbitrary"),
            vmem_limit_bytes=int(vmem_limit),
        ),
        cost_estimate=cost,
    )(xproj, whh_t_pad)

    out = out_pad[:S, :B, :H]                 # drop seq / batch / lane padding
    hidden = out[S - 1:S]                     # (1, B, H) — final hidden state
    return out, hidden


def reference_forward(indices, params):
    """Pure-JAX reference (lax.scan) mirroring PyTorch nn.RNN semantics."""
    x = params["embedding"][indices]                     # (S, B, H)
    w_ih, w_hh = params["w_ih"], params["w_hh"]
    b_ih, b_hh = params["b_ih"], params["b_hh"]
    B, H = x.shape[1], x.shape[2]

    def step(h, x_t):
        h_new = jnp.tanh(x_t @ w_ih.T + b_ih + h @ w_hh.T + b_hh)
        return h_new, h_new

    h0 = jnp.zeros((B, H), jnp.float32)
    h_last, outs = lax.scan(step, h0, x)
    return outs, h_last[None]


def init_params(key, input_size, hidden_size):
    k_emb, k_wih, k_whh, k_bih, k_bhh = jax.random.split(key, 5)
    bound = 1.0 / jnp.sqrt(hidden_size)
    return {
        # nn.Embedding default init: N(0, 1)
        "embedding": jax.random.normal(k_emb, (input_size, hidden_size), jnp.float32),
        # nn.RNN default init: U(-1/sqrt(H), 1/sqrt(H))
        "w_ih": jax.random.uniform(k_wih, (hidden_size, hidden_size), jnp.float32,
                                   -bound, bound),
        "w_hh": jax.random.uniform(k_whh, (hidden_size, hidden_size), jnp.float32,
                                   -bound, bound),
        "b_ih": jax.random.uniform(k_bih, (hidden_size,), jnp.float32, -bound, bound),
        "b_hh": jax.random.uniform(k_bhh, (hidden_size,), jnp.float32, -bound, bound),
    }


if __name__ == "__main__":
    INPUT_SIZE = 16   # vocab size
    HIDDEN = 32
    SEQ = 8
    BATCH = 2

    key = jax.random.PRNGKey(0)
    k_params, k_idx = jax.random.split(key)
    params = init_params(k_params, INPUT_SIZE, HIDDEN)
    indices = jax.random.randint(k_idx, (SEQ, BATCH), 0, INPUT_SIZE, jnp.int32)

    ref_out, ref_hidden = reference_forward(indices, params)

    # Exact-math path (f32 MXU operands): must match lax.scan reference tightly.
    out32, hid32 = encoder_rnn_forward(indices, params, compute_dtype=jnp.float32)
    out32 = jax.block_until_ready(out32)
    hid32 = jax.block_until_ready(hid32)
    assert out32.shape == (SEQ, BATCH, HIDDEN)
    assert hid32.shape == (1, BATCH, HIDDEN)
    assert jnp.allclose(out32, ref_out, atol=1e-5, rtol=1e-5), \
        float(jnp.abs(out32 - ref_out).max())
    assert jnp.allclose(hid32, ref_hidden, atol=1e-5, rtol=1e-5)

    # Default fast path (bf16 MXU operands, f32 accumulation/carry).
    out_bf, hid_bf = encoder_rnn_forward(indices, params)
    out_bf = jax.block_until_ready(out_bf)
    hid_bf = jax.block_until_ready(hid_bf)
    assert out_bf.shape == (SEQ, BATCH, HIDDEN)
    assert hid_bf.shape == (1, BATCH, HIDDEN)
    assert jnp.allclose(out_bf, ref_out, atol=5e-2, rtol=0.0), \
        float(jnp.abs(out_bf - ref_out).max())
    assert jnp.allclose(hid_bf, ref_hidden, atol=5e-2, rtol=0.0)

    print("KERNEL_OK")
</pallas_src>

<mosaic_0001>
module attributes {stable_mosaic.version = 11 : i64} {
  func.func @rnn_chunk_kernel(%arg0: i32, %arg1: i32, %arg2: memref<8x8x128xf32, #tpu.memory_space<vmem>>, %arg3: memref<128x128xf32, #tpu.memory_space<vmem>>, %arg4: memref<8x8x128xf32, #tpu.memory_space<vmem>>, %arg5: memref<8x128xf32, #tpu.memory_space<vmem>>) attributes {dimension_semantics = [#tpu.dimension_semantics<parallel>, #tpu.dimension_semantics<arbitrary>], iteration_bounds = array<i64: 1, 1>, scalar_prefetch = 0 : i64, scratch_operands = 1 : i64, tpu.core_type = #tpu.core_type<tc>, window_params = [{transform_indices = @transform_0, window_bounds = array<i64: 8, 8, 128>}, {pipeline_mode = #tpu.pipeline_mode<synchronous>, transform_indices = @transform_1, window_bounds = array<i64: 128, 128>}, {transform_indices = @transform_2, window_bounds = array<i64: 8, 8, 128>}]} {
    %c0_i32 = arith.constant 0 : i32
    %0 = arith.cmpi eq, %arg1, %c0_i32 : i32
    %1 = arith.extui %0 : i1 to i32
    %c0_i32_0 = arith.constant 0 : i32
    %2 = arith.cmpi ne, %1, %c0_i32_0 : i32
    scf.if %2 {
      %cst_46 = arith.constant 0.000000e+00 : f32
      %86 = vector.broadcast %cst_46 : f32 to vector<8x128xf32>
      %c0_47 = arith.constant 0 : index
      %c0_48 = arith.constant 0 : index
      %87 = vector.load %arg5[%c0_47, %c0_48] : memref<8x128xf32, #tpu.memory_space<vmem>>, vector<8x128xf32>
      tpu.vector_store %arg5[%c0_47, %c0_48], %86 {strides = array<i32>} : memref<8x128xf32, #tpu.memory_space<vmem>>, vector<8x128xf32>,
    } else {
    }
    %c0 = arith.constant 0 : index
    %c0_1 = arith.constant 0 : index
    %3 = vector.load %arg3[%c0, %c0_1] : memref<128x128xf32, #tpu.memory_space<vmem>>, vector<128x128xf32>
    %c0_2 = arith.constant 0 : index
    %c0_3 = arith.constant 0 : index
    %4 = vector.load %arg5[%c0_2, %c0_3] : memref<8x128xf32, #tpu.memory_space<vmem>>, vector<8x128xf32>
    %c0_i32_4 = arith.constant 0 : i32
    %5 = arith.index_cast %c0_i32_4 : i32 to index
    %c0_5 = arith.constant 0 : index
    %c0_6 = arith.constant 0 : index
    %6 = vector.load %arg2[%5, %c0_5, %c0_6] : memref<8x8x128xf32, #tpu.memory_space<vmem>>, vector<1x8x128xf32>
    %7 = vector.shape_cast %6 : vector<1x8x128xf32> to vector<8x128xf32>
    %cst = arith.constant dense<0.000000e+00> : vector<8x128xf32>
    %8 = tpu.matmul %4, %3, %cst {dimension_numbers = #tpu.dot_dimension_numbers<[1], [0], [0], [1], [0, 0, 1, 1], [], []>} : vector<8x128xf32>, vector<128x128xf32>, vector<8x128xf32> -> vector<8x128xf32>
    %9 = arith.addf %7, %8 : vector<8x128xf32>
    %10 = math.tanh %9 : vector<8x128xf32>
    %11 = arith.index_cast %c0_i32_4 : i32 to index
    %c0_7 = arith.constant 0 : index
    %c0_8 = arith.constant 0 : index
    %12 = vector.load %arg4[%11, %c0_7, %c0_8] : memref<8x8x128xf32, #tpu.memory_space<vmem>>, vector<1x8x128xf32>
    %13 = vector.shape_cast %12 : vector<1x8x128xf32> to vector<8x128xf32>
    %14 = vector.shape_cast %10 : vector<8x128xf32> to vector<1x8x128xf32>
    tpu.vector_store %arg4[%11, %c0_7, %c0_8], %14 {strides = array<i32>} : memref<8x8x128xf32, #tpu.memory_space<vmem>>, vector<1x8x128xf32>,
    %c1_i32 = arith.constant 1 : i32
    %15 = arith.index_cast %c1_i32 : i32 to index
    %c0_9 = arith.constant 0 : index
    %c0_10 = arith.constant 0 : index
    %16 = vector.load %arg2[%15, %c0_9, %c0_10] : memref<8x8x128xf32, #tpu.memory_space<vmem>>, vector<1x8x128xf32>
    %17 = vector.shape_cast %16 : vector<1x8x128xf32> to vector<8x128xf32>
    %cst_11 = arith.constant dense<0.000000e+00> : vector<8x128xf32>
    %18 = tpu.matmul %10, %3, %cst_11 {dimension_numbers = #tpu.dot_dimension_numbers<[1], [0], [0], [1], [0, 0, 1, 1], [], []>} : vector<8x128xf32>, vector<128x128xf32>, vector<8x128xf32> -> vector<8x128xf32>
    %19 = arith.addf %17, %18 : vector<8x128xf32>
    %20 = math.tanh %19 : vector<8x128xf32>
    %21 = arith.index_cast %c1_i32 : i32 to index
    %c0_12 = arith.constant 0 : index
    %c0_13 = arith.constant 0 : index
    %22 = vector.load %arg4[%21, %c0_12, %c0_13] : memref<8x8x128xf32, #tpu.memory_space<vmem>>, vector<1x8x128xf32>
    %23 = vector.shape_cast %22 : vector<1x8x128xf32> to vector<8x128xf32>
    %24 = vector.shape_cast %20 : vector<8x128xf32> to vector<1x8x128xf32>
    tpu.vector_store %arg4[%21, %c0_12, %c0_13], %24 {strides = array<i32>} : memref<8x8x128xf32, #tpu.memory_space<vmem>>, vector<1x8x128xf32>,
    %c2_i32 = arith.constant 2 : i32
    %25 = arith.index_cast %c2_i32 : i32 to index
    %c0_14 = arith.constant 0 : index
    %c0_15 = arith.constant 0 : index
    %26 = vector.load %arg2[%25, %c0_14, %c0_15] : memref<8x8x128xf32, #tpu.memory_space<vmem>>, vector<1x8x128xf32>
    %27 = vector.shape_cast %26 : vector<1x8x128xf32> to vector<8x128xf32>
    %cst_16 = arith.constant dense<0.000000e+00> : vector<8x128xf32>
    %28 = tpu.matmul %20, %3, %cst_16 {dimension_numbers = #tpu.dot_dimension_numbers<[1], [0], [0], [1], [0, 0, 1, 1], [], []>} : vector<8x128xf32>, vector<128x128xf32>, vector<8x128xf32> -> vector<8x128xf32>
    %29 = arith.addf %27, %28 : vector<8x128xf32>
    %30 = math.tanh %29 : vector<8x128xf32>
    %31 = arith.index_cast %c2_i32 : i32 to index
    %c0_17 = arith.constant 0 : index
    %c0_18 = arith.constant 0 : index
    %32 = vector.load %arg4[%31, %c0_17, %c0_18] : memref<8x8x128xf32, #tpu.memory_space<vmem>>, vector<1x8x128xf32>
    %33 = vector.shape_cast %32 : vector<1x8x128xf32> to vector<8x128xf32>
    %34 = vector.shape_cast %30 : vector<8x128xf32> to vector<1x8x128xf32>
    tpu.vector_store %arg4[%31, %c0_17, %c0_18], %34 {strides = array<i32>} : memref<8x8x128xf32, #tpu.memory_space<vmem>>, vector<1x8x128xf32>,
    %c3_i32 = arith.constant 3 : i32
    %35 = arith.index_cast %c3_i32 : i32 to index
    %c0_19 = arith.constant 0 : index
    %c0_20 = arith.constant 0 : index
    %36 = vector.load %arg2[%35, %c0_19, %c0_20] : memref<8x8x128xf32, #tpu.memory_space<vmem>>, vector<1x8x128xf32>
    %37 = vector.shape_cast %36 : vector<1x8x128xf32> to vector<8x128xf32>
    %cst_21 = arith.constant dense<0.000000e+00> : vector<8x128xf32>
    %38 = tpu.matmul %30, %3, %cst_21 {dimension_numbers = #tpu.dot_dimension_numbers<[1], [0], [0], [1], [0, 0, 1, 1], [], []>} : vector<8x128xf32>, vector<128x128xf32>, vector<8x128xf32> -> vector<8x128xf32>
    %39 = arith.addf %37, %38 : vector<8x128xf32>
    %40 = math.tanh %39 : vector<8x128xf32>
    %41 = arith.index_cast %c3_i32 : i32 to index
    %c0_22 = arith.constant 0 : index
    %c0_23 = arith.constant 0 : index
    %42 = vector.load %arg4[%41, %c0_22, %c0_23] : memref<8x8x128xf32, #tpu.memory_space<vmem>>, vector<1x8x128xf32>
    %43 = vector.shape_cast %42 : vector<1x8x128xf32> to vector<8x128xf32>
    %44 = vector.shape_cast %40 : vector<8x128xf32> to vector<1x8x128xf32>
    tpu.vector_store %arg4[%41, %c0_22, %c0_23], %44 {strides = array<i32>} : memref<8x8x128xf32, #tpu.memory_space<vmem>>, vector<1x8x128xf32>,
    %c4_i32 = arith.constant 4 : i32
    %45 = arith.index_cast %c4_i32 : i32 to index
    %c0_24 = arith.constant 0 : index
    %c0_25 = arith.constant 0 : index
    %46 = vector.load %arg2[%45, %c0_24, %c0_25] : memref<8x8x128xf32, #tpu.memory_space<vmem>>, vector<1x8x128xf32>
    %47 = vector.shape_cast %46 : vector<1x8x128xf32> to vector<8x128xf32>
    %cst_26 = arith.constant dense<0.000000e+00> : vector<8x128xf32>
    %48 = tpu.matmul %40, %3, %cst_26 {dimension_numbers = #tpu.dot_dimension_numbers<[1], [0], [0], [1], [0, 0, 1, 1], [], []>} : vector<8x128xf32>, vector<128x128xf32>, vector<8x128xf32> -> vector<8x128xf32>
    %49 = arith.addf %47, %48 : vector<8x128xf32>
    %50 = math.tanh %49 : vector<8x128xf32>
    %51 = arith.index_cast %c4_i32 : i32 to index
    %c0_27 = arith.constant 0 : index
    %c0_28 = arith.constant 0 : index
    %52 = vector.load %arg4[%51, %c0_27, %c0_28] : memref<8x8x128xf32, #tpu.memory_space<vmem>>, vector<1x8x128xf32>
    %53 = vector.shape_cast %52 : vector<1x8x128xf32> to vector<8x128xf32>
    %54 = vector.shape_cast %50 : vector<8x128xf32> to vector<1x8x128xf32>
    tpu.vector_store %arg4[%51, %c0_27, %c0_28], %54 {strides = array<i32>} : memref<8x8x128xf32, #tpu.memory_space<vmem>>, vector<1x8x128xf32>,
    %c5_i32 = arith.constant 5 : i32
    %55 = arith.index_cast %c5_i32 : i32 to index
    %c0_29 = arith.constant 0 : index
    %c0_30 = arith.constant 0 : index
    %56 = vector.load %arg2[%55, %c0_29, %c0_30] : memref<8x8x128xf32, #tpu.memory_space<vmem>>, vector<1x8x128xf32>
    %57 = vector.shape_cast %56 : vector<1x8x128xf32> to vector<8x128xf32>
    %cst_31 = arith.constant dense<0.000000e+00> : vector<8x128xf32>
    %58 = tpu.matmul %50, %3, %cst_31 {dimension_numbers = #tpu.dot_dimension_numbers<[1], [0], [0], [1], [0, 0, 1, 1], [], []>} : vector<8x128xf32>, vector<128x128xf32>, vector<8x128xf32> -> vector<8x128xf32>
    %59 = arith.addf %57, %58 : vector<8x128xf32>
    %60 = math.tanh %59 : vector<8x128xf32>
    %61 = arith.index_cast %c5_i32 : i32 to index
    %c0_32 = arith.constant 0 : index
    %c0_33 = arith.constant 0 : index
    %62 = vector.load %arg4[%61, %c0_32, %c0_33] : memref<8x8x128xf32, #tpu.memory_space<vmem>>, vector<1x8x128xf32>
    %63 = vector.shape_cast %62 : vector<1x8x128xf32> to vector<8x128xf32>
    %64 = vector.shape_cast %60 : vector<8x128xf32> to vector<1x8x128xf32>
    tpu.vector_store %arg4[%61, %c0_32, %c0_33], %64 {strides = array<i32>} : memref<8x8x128xf32, #tpu.memory_space<vmem>>, vector<1x8x128xf32>,
    %c6_i32 = arith.constant 6 : i32
    %65 = arith.index_cast %c6_i32 : i32 to index
    %c0_34 = arith.constant 0 : index
    %c0_35 = arith.constant 0 : index
    %66 = vector.load %arg2[%65, %c0_34, %c0_35] : memref<8x8x128xf32, #tpu.memory_space<vmem>>, vector<1x8x128xf32>
    %67 = vector.shape_cast %66 : vector<1x8x128xf32> to vector<8x128xf32>
    %cst_36 = arith.constant dense<0.000000e+00> : vector<8x128xf32>
    %68 = tpu.matmul %60, %3, %cst_36 {dimension_numbers = #tpu.dot_dimension_numbers<[1], [0], [0], [1], [0, 0, 1, 1], [], []>} : vector<8x128xf32>, vector<128x128xf32>, vector<8x128xf32> -> vector<8x128xf32>
    %69 = arith.addf %67, %68 : vector<8x128xf32>
    %70 = math.tanh %69 : vector<8x128xf32>
    %71 = arith.index_cast %c6_i32 : i32 to index
    %c0_37 = arith.constant 0 : index
    %c0_38 = arith.constant 0 : index
    %72 = vector.load %arg4[%71, %c0_37, %c0_38] : memref<8x8x128xf32, #tpu.memory_space<vmem>>, vector<1x8x128xf32>
    %73 = vector.shape_cast %72 : vector<1x8x128xf32> to vector<8x128xf32>
    %74 = vector.shape_cast %70 : vector<8x128xf32> to vector<1x8x128xf32>
    tpu.vector_store %arg4[%71, %c0_37, %c0_38], %74 {strides = array<i32>} : memref<8x8x128xf32, #tpu.memory_space<vmem>>, vector<1x8x128xf32>,
    %c7_i32 = arith.constant 7 : i32
    %75 = arith.index_cast %c7_i32 : i32 to index
    %c0_39 = arith.constant 0 : index
    %c0_40 = arith.constant 0 : index
    %76 = vector.load %arg2[%75, %c0_39, %c0_40] : memref<8x8x128xf32, #tpu.memory_space<vmem>>, vector<1x8x128xf32>
    %77 = vector.shape_cast %76 : vector<1x8x128xf32> to vector<8x128xf32>
    %cst_41 = arith.constant dense<0.000000e+00> : vector<8x128xf32>
    %78 = tpu.matmul %70, %3, %cst_41 {dimension_numbers = #tpu.dot_dimension_numbers<[1], [0], [0], [1], [0, 0, 1, 1], [], []>} : vector<8x128xf32>, vector<128x128xf32>, vector<8x128xf32> -> vector<8x128xf32>
    %79 = arith.addf %77, %78 : vector<8x128xf32>
    %80 = math.tanh %79 : vector<8x128xf32>
    %81 = arith.index_cast %c7_i32 : i32 to index
    %c0_42 = arith.constant 0 : index
    %c0_43 = arith.constant 0 : index
    %82 = vector.load %arg4[%81, %c0_42, %c0_43] : memref<8x8x128xf32, #tpu.memory_space<vmem>>, vector<1x8x128xf32>
    %83 = vector.shape_cast %82 : vector<1x8x128xf32> to vector<8x128xf32>
    %84 = vector.shape_cast %80 : vector<8x128xf32> to vector<1x8x128xf32>
    tpu.vector_store %arg4[%81, %c0_42, %c0_43], %84 {strides = array<i32>} : memref<8x8x128xf32, #tpu.memory_space<vmem>>, vector<1x8x128xf32>,
    %c8_i32 = arith.constant 8 : i32
    %c0_44 = arith.constant 0 : index
    %c0_45 = arith.constant 0 : index
    %85 = vector.load %arg5[%c0_44, %c0_45] : memref<8x128xf32, #tpu.memory_space<vmem>>, vector<8x128xf32>
    tpu.vector_store %arg5[%c0_44, %c0_45], %80 {strides = array<i32>} : memref<8x128xf32, #tpu.memory_space<vmem>>, vector<8x128xf32>,
    return
  }
  func.func @transform_0(%arg0: i32, %arg1: i32) -> (i32, i32, i32) {
    %c0_i32 = arith.constant 0 : i32
    %c0_i32_0 = arith.constant 0 : i32
    return %arg1, %arg0, %c0_i32 : i32, i32, i32
  }
  func.func @transform_1(%arg0: i32, %arg1: i32) -> (i32, i32) {
    %c0_i32 = arith.constant 0 : i32
    %c0_i32_0 = arith.constant 0 : i32
    %c0_i32_1 = arith.constant 0 : i32
    return %c0_i32, %c0_i32_0 : i32, i32
  }
  func.func @transform_2(%arg0: i32, %arg1: i32) -> (i32, i32, i32) {
    %c0_i32 = arith.constant 0 : i32
    %c0_i32_0 = arith.constant 0 : i32
    return %arg1, %arg0, %c0_i32 : i32, i32, i32
  }
}

</mosaic_0001>

<bundles_post_ra>
// kernel: tpu_custom_call.1
= control target key start
LH: loop header
LB: loop body
LE: loop exit
PB: predicated region body
PF: predicated region fallthrough
CT: control target
= control target key end

     0   :  { %7 = vsyncpa [#allocation4], 0  ;;  %s1620_s0 = inlined_call_operand.hbm [shape: f32[8,8,128], index: 0, kind: input, shape index: {}]   ;;  %s1621_s1 = inlined_call_operand.hbm [shape: f32[128,128], index: 1, kind: input, shape index: {}]   ;;  %s1622_s2 = inlined_call_operand.hbm [shape: f32[8,8,128], index: 2, kind: output, shape index: {}]  }
   0x1   :  { %8 = vsyncpa [#allocation7], 0 }
   0x2   :  { %9 = vsyncpa [#allocation5], 0  ;;  %s1391_s9 = smov [#allocation3]   ;;  %s1319_s13 = scalar_lea.hbm %s1620_s0, 1024 }
   0x3   :  { %s15_s10 = sshll.u32 %s1391_s9, 4  ;;  %p1320_p0 = scmp.ne.s32.totalorder %s1620_s0, %s1319_s13  ;;  %s16_s10 = int_to_ptr.vmem [resolvable:$true] %s15_s10 }
   0x4   :  { %p1323_p1 = scmp.lt.u32.totalorder %s1319_s13, %s1620_s0 }
   0x6   :  { %p1325_p2 = pnand %p1323_p1, %p1320_p0 }
   0x8   :  { %1328 = shalt.err (!%p1325_p2)
}
   0x9   :  { %s1329_s18 = scalar_lea.vmem %s16_s10, 1024  ;;  %p1334_p4 = scmp.lt.s32.totalorder %s16_s10, %s16_s10 }
   0xa   :  { %p1330_p3 = scmp.ne.s32.totalorder %s16_s10, %s1329_s18  ;;  %p1335_p5 = scmp.lt.s32.totalorder %s1329_s18, %s1329_s18 }
   0xc   :  { %p1336_p6 = por %p1335_p5, %p1334_p4 }
   0xe   :  { %p1337_p7 = pnand %p1336_p6, %p1330_p3 }
  0x10   :  { %1340 = shalt.err (!%p1337_p7)
}
  0x11   :  { %s1392_s19 = smov 128   ;;  %s1393_s20 = smov 8  }
  0x12   :  { %21 = dma.hbm_to_vmem [thread:$0]  %s1620_s0, 1024, %s16_s10, [#allocation4], %s1392_s19, %s1392_s19, %s1393_s20  }
  0x13   :  { %s1394_s23 = smov [#allocation6]   ;;  %s1341_s27 = scalar_lea.hbm %s1621_s1, 2048 }
  0x14   :  { %s27_s24 = sshll.u32 %s1394_s23, 4  ;;  %p1342_p8 = scmp.ne.s32.totalorder %s1621_s1, %s1341_s27  ;;  %s28_s24 = int_to_ptr.vmem [resolvable:$true] %s27_s24 }
  0x15   :  { %p1345_p9 = scmp.lt.u32.totalorder %s1341_s27, %s1621_s1 }
  0x17   :  { %p1347_p10 = pnand %p1345_p9, %p1342_p8 }
  0x19   :  { %1350 = shalt.err (!%p1347_p10)
}
  0x1a   :  { %s1351_s4 = scalar_lea.vmem %s28_s24, 2048  ;;  %p1356_p12 = scmp.lt.s32.totalorder %s28_s24, %s28_s24 }
  0x1b   :  { %p1352_p11 = scmp.ne.s32.totalorder %s28_s24, %s1351_s4  ;;  %p1357_p13 = scmp.lt.s32.totalorder %s1351_s4, %s1351_s4 }
  0x1d   :  { %p1358_p0 = por %p1357_p13, %p1356_p12 }
  0x1f   :  { %p1359_p1 = pnand %p1358_p0, %p1352_p11 }
  0x21   :  { %1362 = shalt.err (!%p1359_p1)
}
  0x22   :  { %33 = dma.hbm_to_vmem [thread:$0]  %s1621_s1, 2048, %s28_s24, [#allocation7], %s1392_s19, %s1392_s19, %s1393_s20  }
  0x23   :  { %1385 = dma.done.wait [#allocation4], 1024  }
  0x24   :  { %1386 = vsyncadd [#allocation4], 4294966272 }
  0x25   :  { %1387 = dma.done.wait [#allocation7], 2048  }
  0x26   :  { %1388 = vsyncadd [#allocation7], 4294965248  ;;  %v1395_v0 = vmov 0.0|0.0   ;;  %vm1396_vm0 = vmmov 0   ;;  %v1397_v1 = vmov 0.0   ;;  %v45_v2 = vld [vmem:[#allocation6] sm:$0xff] }
  0x27   :  { %1103 = vmatprep.subr.bf16.mxu0 %v1395_v0  ;;  %855 = vmatprep.mubr.msk.f32.mxu0 %vm1396_vm0, %v1397_v1  ;;  %v46_v3 = vld [vmem:[#allocation6 + $0x8] sm:$0xff]  ;;  %v47_v4 = vld [vmem:[#allocation6 + $0x10] sm:$0xff]  ;;  %v48_v6 = vld [vmem:[#allocation6 + $0x18] sm:$0xff]  ;;  %s1398_s1 = smov [#allocation8]  }
  0x28   :  { %1127 = vmatprep.subr.bf16.mxu1 %v1395_v0  ;;  %890 = vmatprep.mubr.msk.f32.mxu1 %vm1396_vm0, %v1397_v1  ;;  %v1450_v5 = vpack.c.bf16 %v46_v3, %v45_v2  ;;  %v1453_v7 = vpack.c.bf16 %v48_v6, %v47_v4  ;;  %v49_v8 = vld [vmem:[#allocation6 + $0x20] sm:$0xff]  ;;  %v50_v9 = vld [vmem:[#allocation6 + $0x28] sm:$0xff]  ;;  %v51_v11 = vld [vmem:[#allocation6 + $0x30] sm:$0xff]  ;;  %s674_s6 = sshll.u32 %s1398_s1, 4  ;;  %s675_s6 = int_to_ptr.vmem [resolvable:$true] %s674_s6 }
  0x29   :  { %v1459_v10 = vpack.c.bf16 %v50_v9, %v49_v8  ;;  %v52_v12 = vld [vmem:[#allocation6 + $0x38] sm:$0xff]  ;;  %v53_v14 = vld [vmem:[#allocation6 + $0x40] sm:$0xff]  ;;  %v54_v15 = vld [vmem:[#allocation6 + $0x48] sm:$0xff]  ;;  %s1363_s7 = scalar_lea.vmem %s675_s6, 1024  ;;  %p1368_p3 = scmp.lt.s32.totalorder %s675_s6, %s675_s6 }
  0x2a   :  { %1105 = vmatpush3.bf16.msra.mxu0 %v1450_v5  ;;  %1129 = vmatpush3.bf16.msra.mxu1 %v1450_v5  ;;  %v1465_v13 = vpack.c.bf16 %v52_v12, %v51_v11  ;;  %v1471_v16 = vpack.c.bf16 %v54_v15, %v53_v14  ;;  %v55_v17 = vld [vmem:[#allocation6 + $0x50] sm:$0xff]  ;;  %v56_v18 = vld [vmem:[#allocation6 + $0x58] sm:$0xff]  ;;  %v57_v20 = vld [vmem:[#allocation6 + $0x60] sm:$0xff]  ;;  %p1364_p2 = scmp.ne.s32.totalorder %s675_s6, %s1363_s7  ;;  %p1369_p4 = scmp.lt.s32.totalorder %s1363_s7, %s1363_s7 }
  0x2b   :  { %1106 = vmatprep.subr.bf16.mxu0 %v1395_v0  ;;  %1130 = vmatprep.subr.bf16.mxu1 %v1395_v0  ;;  %v1477_v19 = vpack.c.bf16 %v56_v18, %v55_v17  ;;  %v58_v21 = vld [vmem:[#allocation6 + $0x68] sm:$0xff]  ;;  %v59_v23 = vld [vmem:[#allocation6 + $0x70] sm:$0xff]  ;;  %v60_v24 = vld [vmem:[#allocation6 + $0x78] sm:$0xff] }
  0x2c   :  { %v1483_v22 = vpack.c.bf16 %v58_v21, %v57_v20  ;;  %v1489_v25 = vpack.c.bf16 %v60_v24, %v59_v23  ;;  %v62_v26 = vld [vmem:[#allocation3] sm:$0xff]  ;;  %v137_v31 = vld [vmem:[#allocation3 + $0x8] sm:$0xff]  ;;  %v213_v36 = vld [vmem:[#allocation3 + $0x10] sm:$0xff]  ;;  %p1370_p5 = por %p1369_p4, %p1368_p3 }
  0x2d   :  { %v289_v41 = vld [vmem:[#allocation3 + $0x18] sm:$0xff]  ;;  %v365_v46 = vld [vmem:[#allocation3 + $0x20] sm:$0xff]  ;;  %v441_v51 = vld [vmem:[#allocation3 + $0x28] sm:$0xff] }
  0x2e   :  { %1108 = vmatpush3.bf16.msra.mxu0 %v1453_v7  ;;  %1132 = vmatpush3.bf16.msra.mxu1 %v1453_v7  ;;  %v517_v56 = vld [vmem:[#allocation3 + $0x30] sm:$0xff]  ;;  %v593_v61 = vld [vmem:[#allocation3 + $0x38] sm:$0xff]  ;;  %p1371_p6 = pnand %p1370_p5, %p1364_p2 }
  0x2f   :  { %1109 = vmatprep.subr.bf16.mxu0 %v1395_v0  ;;  %1133 = vmatprep.subr.bf16.mxu1 %v1395_v0 }
  0x32   :  { %1111 = vmatpush3.bf16.msra.mxu0 %v1459_v10  ;;  %1135 = vmatpush3.bf16.msra.mxu1 %v1459_v10 }
  0x33   :  { %1112 = vmatprep.subr.bf16.mxu0 %v1395_v0  ;;  %1136 = vmatprep.subr.bf16.mxu1 %v1395_v0 }
  0x36   :  { %1114 = vmatpush3.bf16.msra.mxu0 %v1465_v13  ;;  %1138 = vmatpush3.bf16.msra.mxu1 %v1465_v13 }
  0x37   :  { %1115 = vmatprep.subr.bf16.mxu0 %v1395_v0  ;;  %1139 = vmatprep.subr.bf16.mxu1 %v1395_v0 }
  0x3a   :  { %1117 = vmatpush3.bf16.msra.mxu0 %v1471_v16  ;;  %1141 = vmatpush3.bf16.msra.mxu1 %v1471_v16 }
  0x3b   :  { %1118 = vmatprep.subr.bf16.mxu0 %v1395_v0  ;;  %1142 = vmatprep.subr.bf16.mxu1 %v1395_v0 }
  0x3e   :  { %1120 = vmatpush3.bf16.msra.mxu0 %v1477_v19  ;;  %1144 = vmatpush3.bf16.msra.mxu1 %v1477_v19 }
  0x3f   :  { %1121 = vmatprep.subr.bf16.mxu0 %v1395_v0  ;;  %1145 = vmatprep.subr.bf16.mxu1 %v1395_v0 }
  0x42   :  { %1123 = vmatpush3.bf16.msra.mxu0 %v1483_v22  ;;  %1147 = vmatpush3.bf16.msra.mxu1 %v1483_v22 }
  0x43   :  { %1124 = vmatprep.subr.bf16.mxu0 %v1395_v0  ;;  %1148 = vmatprep.subr.bf16.mxu1 %v1395_v0 }
  0x46   :  { %1126 = vmatpush3.bf16.msra.mxu0 %v1489_v25  ;;  %1150 = vmatpush3.bf16.msra.mxu1 %v1489_v25 }
  0x47   :  { %1151 = vmatprep.subr.bf16.mxu0 %v1395_v0  ;;  %1175 = vmatprep.subr.bf16.mxu1 %v1395_v0 }
  0x49   :  { %856 = vmatmul.mubr.f32.vlgmr.msra.gmra.mrb[0].mxu0 %v1397_v1 }
  0x4a   :  { %1153 = vmatpush3.bf16.msra.mxu0 %v1450_v5  ;;  %925 = vmatprep.mubr.msk.f32.mxu0 %vm1396_vm0, %v1397_v1 }
  0x4b   :  { %1154 = vmatprep.subr.bf16.mxu0 %v1395_v0 }
  0x4e   :  { %1156 = vmatpush3.bf16.msra.mxu0 %v1453_v7 }
  0x4f   :  { %1157 = vmatprep.subr.bf16.mxu0 %v1395_v0 }
  0x52   :  { %1159 = vmatpush3.bf16.msra.mxu0 %v1459_v10 }
  0x53   :  { %1160 = vmatprep.subr.bf16.mxu0 %v1395_v0 }
  0x56   :  { %1162 = vmatpush3.bf16.msra.mxu0 %v1465_v13 }
  0x57   :  { %1163 = vmatprep.subr.bf16.mxu0 %v1395_v0 }
  0x5a   :  { %1165 = vmatpush3.bf16.msra.mxu0 %v1471_v16 }
  0x5b   :  { %1166 = vmatprep.subr.bf16.mxu0 %v1395_v0 }
  0x5e   :  { %1168 = vmatpush3.bf16.msra.mxu0 %v1477_v19 }
  0x5f   :  { %1169 = vmatprep.subr.bf16.mxu0 %v1395_v0 }
  0x62   :  { %1171 = vmatpush3.bf16.msra.mxu0 %v1483_v22 }
  0x63   :  { %1172 = vmatprep.subr.bf16.mxu0 %v1395_v0 }
  0x66   :  { %1174 = vmatpush3.bf16.msra.mxu0 %v1489_v25 }
  0x67   :  { %1199 = vmatprep.subr.bf16.mxu0 %v1395_v0 }
 0x11c   :  { %v129_v27 = vpop.f32.mrb[0].mxu0 }
 0x11d   :  { %v133_v28 = vadd.f32 %v129_v27, %v62_v26  ;;  %v857_v29 = vpop.f32.mrb[1].mxu0 }
 0x11f   :  { %1303 = vtanh.f32 %v133_v28 }
 0x129   :  { %v1304_v30 = vpop.eup %1303 }
 0x12a   :  { %135 = vst [vmem:[#allocation8] sm:$0xff] %v1304_v30  ;;  %891 = vmatmul.mubr.f32.vlgmr.msra.gmra.mrb[0].mxu1 %v1304_v30 }
 0x12b   :  { %1177 = vmatpush3.bf16.msra.mxu1 %v1450_v5  ;;  %960 = vmatprep.mubr.msk.f32.mxu1 %vm1396_vm0, %v1397_v1 }
 0x12c   :  { %1178 = vmatprep.subr.bf16.mxu1 %v1395_v0 }
 0x12f   :  { %1180 = vmatpush3.bf16.msra.mxu1 %v1453_v7 }
 0x130   :  { %1181 = vmatprep.subr.bf16.mxu1 %v1395_v0 }
 0x133   :  { %1183 = vmatpush3.bf16.msra.mxu1 %v1459_v10 }
 0x134   :  { %1184 = vmatprep.subr.bf16.mxu1 %v1395_v0 }
 0x137   :  { %1186 = vmatpush3.bf16.msra.mxu1 %v1465_v13 }
 0x138   :  { %1187 = vmatprep.subr.bf16.mxu1 %v1395_v0 }
 0x13b   :  { %1189 = vmatpush3.bf16.msra.mxu1 %v1471_v16 }
 0x13c   :  { %1190 = vmatprep.subr.bf16.mxu1 %v1395_v0 }
 0x13f   :  { %1192 = vmatpush3.bf16.msra.mxu1 %v1477_v19 }
 0x140   :  { %1193 = vmatprep.subr.bf16.mxu1 %v1395_v0 }
 0x143   :  { %1195 = vmatpush3.bf16.msra.mxu1 %v1483_v22 }
 0x144   :  { %1196 = vmatprep.subr.bf16.mxu1 %v1395_v0 }
 0x147   :  { %1198 = vmatpush3.bf16.msra.mxu1 %v1489_v25 }
 0x148   :  { %1223 = vmatprep.subr.bf16.mxu1 %v1395_v0 }
 0x1fd   :  { %v204_v32 = vpop.f32.mrb[0].mxu1 }
 0x1fe   :  { %v208_v33 = vadd.f32 %v204_v32, %v137_v31  ;;  %v892_v34 = vpop.f32.mrb[1].mxu1 }
 0x200   :  { %1305 = vtanh.f32 %v208_v33 }
 0x20a   :  { %v1306_v35 = vpop.eup %1305 }
 0x20b   :  { %211 = vst [vmem:[#allocation8 + $0x8] sm:$0xff] %v1306_v35  ;;  %926 = vmatmul.mubr.f32.vlgmr.msra.gmra.mrb[2].mxu0 %v1306_v35 }
 0x20c   :  { %1201 = vmatpush3.bf16.msra.mxu0 %v1450_v5  ;;  %995 = vmatprep.mubr.msk.f32.mxu0 %vm1396_vm0, %v1397_v1 }
 0x20d   :  { %1202 = vmatprep.subr.bf16.mxu0 %v1395_v0 }
 0x210   :  { %1204 = vmatpush3.bf16.msra.mxu0 %v1453_v7 }
 0x211   :  { %1205 = vmatprep.subr.bf16.mxu0 %v1395_v0 }
 0x214   :  { %1207 = vmatpush3.bf16.msra.mxu0 %v1459_v10 }
 0x215   :  { %1208 = vmatprep.subr.bf16.mxu0 %v1395_v0 }
 0x218   :  { %1210 = vmatpush3.bf16.msra.mxu0 %v1465_v13 }
 0x219   :  { %1211 = vmatprep.subr.bf16.mxu0 %v1395_v0 }
 0x21c   :  { %1213 = vmatpush3.bf16.msra.mxu0 %v1471_v16 }
 0x21d   :  { %1214 = vmatprep.subr.bf16.mxu0 %v1395_v0 }
 0x220   :  { %1216 = vmatpush3.bf16.msra.mxu0 %v1477_v19 }
 0x221   :  { %1217 = vmatprep.subr.bf16.mxu0 %v1395_v0 }
 0x224   :  { %1219 = vmatpush3.bf16.msra.mxu0 %v1483_v22 }
 0x225   :  { %1220 = vmatprep.subr.bf16.mxu0 %v1395_v0 }
 0x228   :  { %1222 = vmatpush3.bf16.msra.mxu0 %v1489_v25 }
 0x229   :  { %1247 = vmatprep.subr.bf16.mxu0 %v1395_v0 }
 0x2de   :  { %v280_v37 = vpop.f32.mrb[2].mxu0 }
 0x2df   :  { %v284_v38 = vadd.f32 %v280_v37, %v213_v36  ;;  %v927_v39 = vpop.f32.mrb[3].mxu0 }
 0x2e1   :  { %1307 = vtanh.f32 %v284_v38 }
 0x2eb   :  { %v1308_v40 = vpop.eup %1307 }
 0x2ec   :  { %287 = vst [vmem:[#allocation8 + $0x10] sm:$0xff] %v1308_v40  ;;  %961 = vmatmul.mubr.f32.vlgmr.msra.gmra.mrb[2].mxu1 %v1308_v40 }
 0x2ed   :  { %1225 = vmatpush3.bf16.msra.mxu1 %v1450_v5  ;;  %1030 = vmatprep.mubr.msk.f32.mxu1 %vm1396_vm0, %v1397_v1 }
 0x2ee   :  { %1226 = vmatprep.subr.bf16.mxu1 %v1395_v0 }
 0x2f1   :  { %1228 = vmatpush3.bf16.msra.mxu1 %v1453_v7 }
 0x2f2   :  { %1229 = vmatprep.subr.bf16.mxu1 %v1395_v0 }
 0x2f5   :  { %1231 = vmatpush3.bf16.msra.mxu1 %v1459_v10 }
 0x2f6   :  { %1232 = vmatprep.subr.bf16.mxu1 %v1395_v0 }
 0x2f9   :  { %1234 = vmatpush3.bf16.msra.mxu1 %v1465_v13 }
 0x2fa   :  { %1235 = vmatprep.subr.bf16.mxu1 %v1395_v0 }
 0x2fd   :  { %1237 = vmatpush3.bf16.msra.mxu1 %v1471_v16 }
 0x2fe   :  { %1238 = vmatprep.subr.bf16.mxu1 %v1395_v0 }
 0x301   :  { %1240 = vmatpush3.bf16.msra.mxu1 %v1477_v19 }
 0x302   :  { %1241 = vmatprep.subr.bf16.mxu1 %v1395_v0 }
 0x305   :  { %1243 = vmatpush3.bf16.msra.mxu1 %v1483_v22 }
 0x306   :  { %1244 = vmatprep.subr.bf16.mxu1 %v1395_v0 }
 0x309   :  { %1246 = vmatpush3.bf16.msra.mxu1 %v1489_v25 }
 0x30a   :  { %1271 = vmatprep.subr.bf16.mxu1 %v1395_v0 }
 0x3bf   :  { %v356_v42 = vpop.f32.mrb[2].mxu1 }
 0x3c0   :  { %v360_v43 = vadd.f32 %v356_v42, %v289_v41  ;;  %v962_v44 = vpop.f32.mrb[3].mxu1 }
 0x3c2   :  { %1309 = vtanh.f32 %v360_v43 }
 0x3cc   :  { %v1310_v45 = vpop.eup %1309 }
 0x3cd   :  { %363 = vst [vmem:[#allocation8 + $0x18] sm:$0xff] %v1310_v45  ;;  %996 = vmatmul.mubr.f32.vlgmr.msra.gmra.mrb[4].mxu0 %v1310_v45 }
 0x3ce   :  { %1249 = vmatpush3.bf16.msra.mxu0 %v1450_v5  ;;  %1065 = vmatprep.mubr.msk.f32.mxu0 %vm1396_vm0, %v1397_v1 }
 0x3cf   :  { %1250 = vmatprep.subr.bf16.mxu0 %v1395_v0 }
 0x3d2   :  { %1252 = vmatpush3.bf16.msra.mxu0 %v1453_v7 }
 0x3d3   :  { %1253 = vmatprep.subr.bf16.mxu0 %v1395_v0 }
 0x3d6   :  { %1255 = vmatpush3.bf16.msra.mxu0 %v1459_v10 }
 0x3d7   :  { %1256 = vmatprep.subr.bf16.mxu0 %v1395_v0 }
 0x3da   :  { %1258 = vmatpush3.bf16.msra.mxu0 %v1465_v13 }
 0x3db   :  { %1259 = vmatprep.subr.bf16.mxu0 %v1395_v0 }
 0x3de   :  { %1261 = vmatpush3.bf16.msra.mxu0 %v1471_v16 }
 0x3df   :  { %1262 = vmatprep.subr.bf16.mxu0 %v1395_v0 }
 0x3e2   :  { %1264 = vmatpush3.bf16.msra.mxu0 %v1477_v19 }
 0x3e3   :  { %1265 = vmatprep.subr.bf16.mxu0 %v1395_v0 }
 0x3e6   :  { %1267 = vmatpush3.bf16.msra.mxu0 %v1483_v22 }
 0x3e7   :  { %1268 = vmatprep.subr.bf16.mxu0 %v1395_v0 }
 0x3ea   :  { %1270 = vmatpush3.bf16.msra.mxu0 %v1489_v25 }
 0x4a0   :  { %v432_v47 = vpop.f32.mrb[4].mxu0 }
 0x4a1   :  { %v436_v48 = vadd.f32 %v432_v47, %v365_v46  ;;  %v997_v49 = vpop.f32.mrb[5].mxu0 }
 0x4a3   :  { %1311 = vtanh.f32 %v436_v48 }
 0x4ad   :  { %v1312_v50 = vpop.eup %1311 }
 0x4ae   :  { %439 = vst [vmem:[#allocation8 + $0x20] sm:$0xff] %v1312_v50  ;;  %1031 = vmatmul.mubr.f32.vlgmr.msra.gmra.mrb[4].mxu1 %v1312_v50 }
 0x4af   :  { %1273 = vmatpush3.bf16.msra.mxu1 %v1450_v5  ;;  %1100 = vmatprep.mubr.msk.f32.mxu1 %vm1396_vm0, %v1397_v1 }
 0x4b0   :  { %1274 = vmatprep.subr.bf16.mxu1 %v1395_v0 }
 0x4b3   :  { %1276 = vmatpush3.bf16.msra.mxu1 %v1453_v7 }
 0x4b4   :  { %1277 = vmatprep.subr.bf16.mxu1 %v1395_v0 }
 0x4b7   :  { %1279 = vmatpush3.bf16.msra.mxu1 %v1459_v10 }
 0x4b8   :  { %1280 = vmatprep.subr.bf16.mxu1 %v1395_v0 }
 0x4bb   :  { %1282 = vmatpush3.bf16.msra.mxu1 %v1465_v13 }
 0x4bc   :  { %1283 = vmatprep.subr.bf16.mxu1 %v1395_v0 }
 0x4bf   :  { %1285 = vmatpush3.bf16.msra.mxu1 %v1471_v16 }
 0x4c0   :  { %1286 = vmatprep.subr.bf16.mxu1 %v1395_v0 }
 0x4c3   :  { %1288 = vmatpush3.bf16.msra.mxu1 %v1477_v19 }
 0x4c4   :  { %1289 = vmatprep.subr.bf16.mxu1 %v1395_v0 }
 0x4c7   :  { %1291 = vmatpush3.bf16.msra.mxu1 %v1483_v22 }
 0x4c8   :  { %1292 = vmatprep.subr.bf16.mxu1 %v1395_v0 }
 0x4cb   :  { %1294 = vmatpush3.bf16.msra.mxu1 %v1489_v25 }
 0x581   :  { %v508_v52 = vpop.f32.mrb[4].mxu1 }
 0x582   :  { %v512_v53 = vadd.f32 %v508_v52, %v441_v51  ;;  %v1032_v54 = vpop.f32.mrb[5].mxu1 }
 0x584   :  { %1313 = vtanh.f32 %v512_v53 }
 0x58e   :  { %v1314_v55 = vpop.eup %1313 }
 0x58f   :  { %515 = vst [vmem:[#allocation8 + $0x28] sm:$0xff] %v1314_v55  ;;  %1066 = vmatmul.mubr.f32.vlgmr.msra.gmra.mrb[6].mxu0 %v1314_v55 }
 0x662   :  { %v584_v57 = vpop.f32.mrb[6].mxu0 }
 0x663   :  { %v588_v58 = vadd.f32 %v584_v57, %v517_v56  ;;  %v1067_v59 = vpop.f32.mrb[7].mxu0 }
 0x665   :  { %1315 = vtanh.f32 %v588_v58 }
 0x66f   :  { %v1316_v60 = vpop.eup %1315 }
 0x670   :  { %591 = vst [vmem:[#allocation8 + $0x30] sm:$0xff] %v1316_v60  ;;  %1101 = vmatmul.mubr.f32.vlgmr.msra.gmra.mrb[6].mxu1 %v1316_v60 }
 0x743   :  { %v660_v62 = vpop.f32.mrb[6].mxu1 }
 0x744   :  { %v664_v63 = vadd.f32 %v660_v62, %v593_v61  ;;  %v1102_v0 = vpop.f32.mrb[7].mxu1 }
 0x746   :  { %1317 = vtanh.f32 %v664_v63 }
 0x750   :  { %v1318_v1 = vpop.eup %1317 }
 0x751   :  { %667 = vst [vmem:[#allocation8 + $0x38] sm:$0xff] %v1318_v1 }
 0x752   :  { %1374 = shalt.err (!%p1371_p6)
}
 0x753   :  { %s1375_s10 = scalar_lea.hbm %s1622_s2, 1024 }
 0x754   :  { %p1376_p7 = scmp.ne.s32.totalorder %s1622_s2, %s1375_s10  ;;  %p1379_p8 = scmp.lt.u32.totalorder %s1375_s10, %s1622_s2 }
 0x756   :  { %p1381_p9 = pnand %p1379_p8, %p1376_p7 }
 0x758   :  { %1384 = shalt.err (!%p1381_p9)
}
 0x759   :  { %680 = dma.vmem_to_hbm [thread:$0]  %s675_s6, 1024, %s1622_s2, [#allocation5], %s1392_s19, %s1392_s19, %s1393_s20  }
 0x75a   :  { %1389 = dma.done.wait [#allocation5], 1024  }
 0x75b   :  { %1390 = vsyncadd [#allocation5], 4294966272 }
 0x75c   :  { %684 = vsyncpa [#allocation4], 1 }
 0x75d   :  { %685 = vsyncpa [#allocation7], 1 }
 0x75e   :  { %686 = vsyncpa [#allocation5], 1 }

</bundles_post_ra>
